<compile_context>
chip_gen: v6e
topology: v6e:2x2x1
jax: 0.10.0
libtpu: 0.0.40
codegen_flags: <defaults>
</compile_context>

<pallas_src>
import functools

import jax
import jax.numpy as jnp
from jax.experimental import pallas as pl
from jax.experimental.pallas import tpu as pltpu

_POOL_HALF = 15                       # avg_pool2d padding (kernel 31, stride 1)
_POOL_AREA = 31.0 * 31.0              # count_include_pad=True divisor


def _cdiv(a, b):
    return -(-a // b)


# ----------------------------------------------------------------------------
# Kernel
# ----------------------------------------------------------------------------
def _structure_loss_kernel(pred_ref, mask_ref, bh_ref, bw_ref, out_ref,
                           *, R, H, LW, SLAB):
    """One grid step = R sublane groups of L lane-packed images (R*H rows)."""
    n_slabs = H // SLAB
    zeros_pad = jnp.zeros((5, LW), jnp.float32)

    def group_body(r, carry):
        row0 = r * H
        if H % 8 == 0:
            row0 = pl.multiple_of(row0, 8)

        # W-direction box filter for this group (bf16 is exact: counts <= 31).
        mk_g = mask_ref[0, pl.ds(row0, H), :]                       # (H, LW) bf16
        t_g = jnp.dot(mk_g, bw_ref[...],
                      preferred_element_type=jnp.float32).astype(jnp.bfloat16)

        # Per-group column accumulators (kept slab-shaped; reduced once at end).
        acc_b = jnp.zeros((SLAB, LW), jnp.float32)
        acc_i = jnp.zeros((SLAB, LW), jnp.float32)
        acc_u = jnp.zeros((SLAB, LW), jnp.float32)

        # 8-sublane slabs: bounds live ranges to ~30 vregs -> no spills.
        for s in range(n_slabs):
            sl = slice(s * SLAB, (s + 1) * SLAB)
            start = row0 + s * SLAB
            if H % 8 == 0:
                start = pl.multiple_of(start, 8)

            p = pred_ref[0, pl.ds(start, SLAB), :]                  # (SLAB, LW) f32
            m = mk_g[sl, :].astype(jnp.float32)                     # 0/1 exact

            # H-direction box filter: counts <= 961, exact in f32; keep the
            # 1/961 scale in f32 (NOT folded into the bf16 band matrices).
            box = jnp.dot(bh_ref[sl, :], t_g,
                          preferred_element_type=jnp.float32)
            pooled = box * (1.0 / _POOL_AREA)
            weit = 1.0 + 5.0 * jnp.abs(pooled - m)

            # Stable BCE-with-logits + sigmoid sharing one exp:
            #   e = exp(-|p|); sigmoid(p) = 1/(1+e) (p>=0) or e/(1+e) (p<0)
            # Approximate reciprocal (EUP) is used ONLY for the sigmoid; the
            # BCE log term uses the exact log(1+e).
            e = jnp.exp(-jnp.abs(p))
            one_e = 1.0 + e
            inv = pl.reciprocal(one_e, approx=True)
            sig = jnp.where(p >= 0.0, inv, e * inv)
            bce = jnp.maximum(p, 0.0) - p * m + jnp.log(one_e)

            acc_b = acc_b + bce
            acc_i = acc_i + sig * m * weit
            acc_u = acc_u + (sig + m) * weit

        # One aligned, unmasked (8, LW) store per group (3 data + 5 zero rows).
        rows = jnp.concatenate(
            [jnp.sum(acc_b, axis=0, keepdims=True),
             jnp.sum(acc_i, axis=0, keepdims=True),
             jnp.sum(acc_u, axis=0, keepdims=True),
             zeros_pad], axis=0)                                    # (8, LW)
        out_ref[0, pl.ds(pl.multiple_of(8 * r, 8), 8), :] = rows
        return carry

    jax.lax.fori_loop(0, R, group_body, 0)


# ----------------------------------------------------------------------------
# Wrapper
# ----------------------------------------------------------------------------
def _pack(x, G, R, L, H, W, pad):
    """(NC, H, W) -> (G, R*H, L*W): image i=(g*R+r)*L+l occupies rows
    [r*H,(r+1)*H), lanes [l*W,(l+1)*W) of block g."""
    x = jnp.pad(x, ((0, pad), (0, 0), (0, 0)))
    x = x.reshape(G, R, L, H, W).transpose(0, 1, 3, 2, 4)
    return x.reshape(G, R * H, L * W)


def _choose_tiling(NC, H, W):
    LANE_TARGET = 256                  # matches v6e/v7x 256-wide MXU
    ROW_TARGET = 2048                  # sublane rows per grid step
    VMEM_BUDGET = 20 * 1024 * 1024     # working-set cap (safe for v7x 64 MiB)

    L = max(1, min(LANE_TARGET // max(W, 1), NC))
    LW = L * W
    n_groups = _cdiv(NC, L)
    R = max(1, min(max(1, ROW_TARGET // H), n_groups))

    def ws_bytes(r):
        blk = r * H * LW
        return (2 * blk * 4            # pred, double-buffered f32
                + 2 * blk * 2          # mask, double-buffered bf16
                + 2 * 8 * r * LW * 4   # output block, double-buffered f32
                + 2 * (H * H + LW * LW) * 2)   # band matrices (bf16)

    while R > 1 and ws_bytes(R) > VMEM_BUDGET:
        R = _cdiv(R, 2)
    G = _cdiv(n_groups, R)
    if G == 1 and n_groups >= 2:       # keep >=2 balanced grid steps (v7x megacore)
        R = _cdiv(n_groups, 2)
        G = _cdiv(n_groups, R)
    vmem_limit = int(min(max(2 * ws_bytes(R), 16 * 1024 * 1024),
                         40 * 1024 * 1024))
    return L, R, G, LW, vmem_limit


@jax.jit
def structure_loss(pred, mask):
    """pred, mask: (N, C, H, W) like PyTorch (mask is a 0/1 target). Scalar loss."""
    N, C, H, W = pred.shape
    NC = N * C

    L, R, G, LW, vmem_limit = _choose_tiling(NC, H, W)
    TB = R * L
    NCp = G * TB
    pad = NCp - NC

    # Lane-pack; allow_input_fusion lets XLA fuse this repack into the Pallas
    # input copy (no extra HBM round trip).  Mask travels as bf16 (exact 0/1).
    pred_p = _pack(pred.reshape(NC, H, W).astype(jnp.float32), G, R, L, H, W, pad)
    mask_p = _pack(mask.reshape(NC, H, W).astype(jnp.bfloat16), G, R, L, H, W, pad)

    # 0/1 band matrices for the separable 31x31 box filter (bf16 exact, MXU-native).
    ih = jnp.arange(H)
    bh = (jnp.abs(ih[:, None] - ih[None, :]) <= _POOL_HALF).astype(jnp.bfloat16)
    iw = jnp.arange(LW)
    bw = ((jnp.abs(iw[:, None] - iw[None, :]) <= _POOL_HALF)
          & ((iw[:, None] // W) == (iw[None, :] // W))).astype(jnp.bfloat16)

    SLAB = 8 if H % 8 == 0 else H

    out = pl.pallas_call(
        functools.partial(_structure_loss_kernel, R=R, H=H, LW=LW, SLAB=SLAB),
        out_shape=jax.ShapeDtypeStruct((G, 8 * R, LW), jnp.float32),
        grid_spec=pltpu.PrefetchScalarGridSpec(
            num_scalar_prefetch=0,
            grid=(G,),
            in_specs=[
                pl.BlockSpec((1, R * H, LW), lambda g: (g, 0, 0)),   # pred  (f32)
                pl.BlockSpec((1, R * H, LW), lambda g: (g, 0, 0)),   # mask  (bf16)
                pl.BlockSpec((H, H), lambda g: (0, 0)),              # BH band
                pl.BlockSpec((LW, LW), lambda g: (0, 0)),            # BW block-diag
            ],
            out_specs=pl.BlockSpec((1, 8 * R, LW), lambda g: (g, 0, 0)),
        ),
        compiler_params=pltpu.CompilerParams(
            dimension_semantics=("parallel",),       # independent output blocks
            vmem_limit_bytes=vmem_limit,
            allow_input_fusion=[True, True, False, False],
        ),
    )(pred_p, mask_p, bh, bw)

    # Finish the tiny per-image W-segment reduction on the host side.
    sums = out.reshape(G, R, 8, L, W).sum(axis=-1)[:, :, :3, :]     # (G, R, 3, L)
    sums = sums.transpose(2, 0, 1, 3).reshape(3, NCp)[:, :NC]
    bce_sum, inter, union = sums[0], sums[1], sums[2]

    # PyTorch legacy reduce='none' -> reduction='mean': wbce is a global scalar;
    # (weit*wbce).sum/weit.sum == wbce exactly (weit >= 1), so use it directly.
    wbce = jnp.sum(bce_sum) / (NC * H * W)
    wiou = 1.0 - (inter + 1.0) / (union - inter + 1.0)              # (NC,)
    return jnp.mean(wbce + wiou)


# ----------------------------------------------------------------------------
# Pure-JAX reference (validation only)
# ----------------------------------------------------------------------------
def structure_loss_reference(pred, mask):
    N, C, H, W = pred.shape
    x = mask.reshape(N * C, H, W).astype(jnp.float32)
    win = jax.lax.reduce_window(
        x, 0.0, jax.lax.add,
        window_dimensions=(1, 31, 31), window_strides=(1, 1, 1),
        padding=((0, 0), (15, 15), (15, 15)))
    pooled = (win / _POOL_AREA).reshape(N, C, H, W)
    weit = 1.0 + 5.0 * jnp.abs(pooled - mask)
    bce = (jnp.maximum(pred, 0.0) - pred * mask
           + jnp.log1p(jnp.exp(-jnp.abs(pred))))
    wbce_scalar = jnp.mean(bce)                      # legacy reduce='none' quirk
    wbce = (weit * wbce_scalar).sum(axis=(2, 3)) / weit.sum(axis=(2, 3))
    sig = jax.nn.sigmoid(pred)
    inter = (sig * mask * weit).sum(axis=(2, 3))
    union = ((sig + mask) * weit).sum(axis=(2, 3))
    wiou = 1.0 - (inter + 1.0) / (union - inter + 1.0)
    return jnp.mean(wbce + wiou)


if __name__ == "__main__":
    key = jax.random.PRNGKey(0)
    k1, k2 = jax.random.split(key)
    # NC=60 -> lane packing L=8 (LW=256), R=4 groups/step, G=2 grid steps
    # (exercises megacore split and the 4 padded images).
    N, C, H, W = 15, 4, 32, 32
    pred = jax.random.normal(k1, (N, C, H, W), dtype=jnp.float32)            # logits
    mask = (jax.random.uniform(k2, (N, C, H, W)) > 0.5).astype(jnp.float32)  # binary GT

    loss = structure_loss(pred, mask)
    jax.block_until_ready(loss)

    ref = structure_loss_reference(pred, mask)
    jax.block_until_ready(ref)
    if not bool(jnp.allclose(loss, ref, rtol=1e-3, atol=1e-5)):
        raise AssertionError(f"mismatch: kernel={float(loss)} ref={float(ref)}")

    print("KERNEL_OK")
</pallas_src>

<mosaic_0001>
module attributes {stable_mosaic.version = 11 : i64} {
  func.func @_structure_loss_kernel(%arg0: i32, %arg1: memref<1x128x256xf32, #tpu.memory_space<vmem>>, %arg2: memref<1x128x256xbf16, #tpu.memory_space<vmem>>, %arg3: memref<32x32xbf16, #tpu.memory_space<vmem>>, %arg4: memref<256x256xbf16, #tpu.memory_space<vmem>>, %arg5: memref<1x32x256xf32, #tpu.memory_space<vmem>>) attributes {dimension_semantics = [#tpu.dimension_semantics<parallel>], iteration_bounds = array<i64: 2>, scalar_prefetch = 0 : i64, scratch_operands = 0 : i64, tpu.core_type = #tpu.core_type<tc>, window_params = [{transform_indices = @transform_0, window_bounds = array<i64: 1, 128, 256>}, {transform_indices = @transform_1, window_bounds = array<i64: 1, 128, 256>}, {pipeline_mode = #tpu.pipeline_mode<synchronous>, transform_indices = @transform_2, window_bounds = array<i64: 32, 32>}, {pipeline_mode = #tpu.pipeline_mode<synchronous>, transform_indices = @transform_3, window_bounds = array<i64: 256, 256>}, {transform_indices = @transform_4, window_bounds = array<i64: 1, 32, 256>}]} {
    %cst = arith.constant 0.000000e+00 : f32
    %0 = vector.broadcast %cst : f32 to vector<5x256xf32>
    %c0_i32 = arith.constant 0 : i32
    %c4_i32 = arith.constant 4 : i32
    %1 = arith.addi %c0_i32, %c4_i32 : i32
    %c1_i32 = arith.constant 1 : i32
    scf.for %arg6 = %c0_i32 to %1 step %c1_i32  : i32 {
      %c32_i32 = arith.constant 32 : i32
      %2 = arith.muli %arg6, %c32_i32 : i32
      %3 = tpu.assume_multiple %2, 8 : i32
      %c0 = arith.constant 0 : index
      %4 = arith.index_cast %3 : i32 to index
      %c0_1 = arith.constant 0 : index
      %5 = vector.load %arg2[%c0, %4, %c0_1] : memref<1x128x256xbf16, #tpu.memory_space<vmem>>, vector<1x32x256xbf16>
      %6 = vector.shape_cast %5 : vector<1x32x256xbf16> to vector<32x256xbf16>
      %c0_2 = arith.constant 0 : index
      %c0_3 = arith.constant 0 : index
      %7 = vector.load %arg4[%c0_2, %c0_3] : memref<256x256xbf16, #tpu.memory_space<vmem>>, vector<256x256xbf16>
      %cst_4 = arith.constant dense<0.000000e+00> : vector<32x256xf32>
      %8 = tpu.matmul %6, %7, %cst_4 {dimension_numbers = #tpu.dot_dimension_numbers<[1], [0], [0], [1], [0, 0, 1, 1], [], []>} : vector<32x256xbf16>, vector<256x256xbf16>, vector<32x256xf32> -> vector<32x256xf32>
      %9 = arith.truncf %8 : vector<32x256xf32> to vector<32x256xbf16>
      %cst_5 = arith.constant 0.000000e+00 : f32
      %10 = vector.broadcast %cst_5 : f32 to vector<8x256xf32>
      %cst_6 = arith.constant 0.000000e+00 : f32
      %11 = vector.broadcast %cst_6 : f32 to vector<8x256xf32>
      %cst_7 = arith.constant 0.000000e+00 : f32
      %12 = vector.broadcast %cst_7 : f32 to vector<8x256xf32>
      %c0_i32_8 = arith.constant 0 : i32
      %13 = arith.addi %3, %c0_i32_8 : i32
      %14 = tpu.assume_multiple %13, 8 : i32
      %c0_9 = arith.constant 0 : index
      %15 = arith.index_cast %14 : i32 to index
      %c0_10 = arith.constant 0 : index
      %16 = vector.load %arg1[%c0_9, %15, %c0_10] : memref<1x128x256xf32, #tpu.memory_space<vmem>>, vector<1x8x256xf32>
      %17 = vector.shape_cast %16 : vector<1x8x256xf32> to vector<8x256xf32>
      %18 = vector.extract_strided_slice %6 {offsets = [0, 0], sizes = [8, 256], strides = [1, 1]} : vector<32x256xbf16> to vector<8x256xbf16>
      %19 = arith.extf %18 : vector<8x256xbf16> to vector<8x256xf32>
      %c0_11 = arith.constant 0 : index
      %c0_12 = arith.constant 0 : index
      %20 = vector.load %arg3[%c0_11, %c0_12] : memref<32x32xbf16, #tpu.memory_space<vmem>>, vector<8x32xbf16>
      %cst_13 = arith.constant dense<0.000000e+00> : vector<8x256xf32>
      %21 = tpu.matmul %20, %9, %cst_13 {dimension_numbers = #tpu.dot_dimension_numbers<[1], [0], [0], [1], [0, 0, 1, 1], [], []>} : vector<8x32xbf16>, vector<32x256xbf16>, vector<8x256xf32> -> vector<8x256xf32>
      %cst_14 = arith.constant 0.00104058278 : f32
      %22 = vector.broadcast %cst_14 : f32 to vector<8x256xf32>
      %23 = arith.mulf %21, %22 : vector<8x256xf32>
      %24 = arith.subf %23, %19 : vector<8x256xf32>
      %25 = math.absf %24 : vector<8x256xf32>
      %cst_15 = arith.constant 5.000000e+00 : f32
      %26 = vector.broadcast %cst_15 : f32 to vector<8x256xf32>
      %27 = arith.mulf %26, %25 : vector<8x256xf32>
      %cst_16 = arith.constant 1.000000e+00 : f32
      %28 = vector.broadcast %cst_16 : f32 to vector<8x256xf32>
      %29 = arith.addf %28, %27 : vector<8x256xf32>
      %30 = math.absf %17 : vector<8x256xf32>
      %cst_17 = arith.constant 0.000000e+00 : f32
      %31 = vector.broadcast %cst_17 : f32 to vector<8x256xf32>
      %32 = arith.subf %31, %30 : vector<8x256xf32>
      %33 = math.exp %32 : vector<8x256xf32>
      %cst_18 = arith.constant 1.000000e+00 : f32
      %34 = vector.broadcast %cst_18 : f32 to vector<8x256xf32>
      %35 = arith.addf %34, %33 : vector<8x256xf32>
      %36 = tpu.reciprocal %35 {approx = true} : vector<8x256xf32> -> vector<8x256xf32>
      %cst_19 = arith.constant 0.000000e+00 : f32
      %37 = vector.broadcast %cst_19 : f32 to vector<8x256xf32>
      %38 = arith.cmpf oge, %17, %37 : vector<8x256xf32>
      %39 = arith.mulf %33, %36 : vector<8x256xf32>
      %40 = arith.select %38, %36, %39 : vector<8x256xi1>, vector<8x256xf32>
      %cst_20 = arith.constant 0.000000e+00 : f32
      %41 = vector.broadcast %cst_20 : f32 to vector<8x256xf32>
      %42 = arith.maximumf %17, %41 : vector<8x256xf32>
      %43 = arith.mulf %17, %19 : vector<8x256xf32>
      %44 = arith.subf %42, %43 : vector<8x256xf32>
      %45 = math.log %35 : vector<8x256xf32>
      %46 = arith.addf %44, %45 : vector<8x256xf32>
      %47 = arith.addf %10, %46 : vector<8x256xf32>
      %48 = arith.mulf %40, %19 : vector<8x256xf32>
      %49 = arith.mulf %48, %29 : vector<8x256xf32>
      %50 = arith.addf %11, %49 : vector<8x256xf32>
      %51 = arith.addf %40, %19 : vector<8x256xf32>
      %52 = arith.mulf %51, %29 : vector<8x256xf32>
      %53 = arith.addf %12, %52 : vector<8x256xf32>
      %c8_i32 = arith.constant 8 : i32
      %54 = arith.addi %3, %c8_i32 : i32
      %55 = tpu.assume_multiple %54, 8 : i32
      %c0_21 = arith.constant 0 : index
      %56 = arith.index_cast %55 : i32 to index
      %c0_22 = arith.constant 0 : index
      %57 = vector.load %arg1[%c0_21, %56, %c0_22] : memref<1x128x256xf32, #tpu.memory_space<vmem>>, vector<1x8x256xf32>
      %58 = vector.shape_cast %57 : vector<1x8x256xf32> to vector<8x256xf32>
      %59 = vector.extract_strided_slice %6 {offsets = [8, 0], sizes = [8, 256], strides = [1, 1]} : vector<32x256xbf16> to vector<8x256xbf16>
      %60 = arith.extf %59 : vector<8x256xbf16> to vector<8x256xf32>
      %c8 = arith.constant 8 : index
      %c0_23 = arith.constant 0 : index
      %61 = vector.load %arg3[%c8, %c0_23] : memref<32x32xbf16, #tpu.memory_space<vmem>>, vector<8x32xbf16>
      %cst_24 = arith.constant dense<0.000000e+00> : vector<8x256xf32>
      %62 = tpu.matmul %61, %9, %cst_24 {dimension_numbers = #tpu.dot_dimension_numbers<[1], [0], [0], [1], [0, 0, 1, 1], [], []>} : vector<8x32xbf16>, vector<32x256xbf16>, vector<8x256xf32> -> vector<8x256xf32>
      %cst_25 = arith.constant 0.00104058278 : f32
      %63 = vector.broadcast %cst_25 : f32 to vector<8x256xf32>
      %64 = arith.mulf %62, %63 : vector<8x256xf32>
      %65 = arith.subf %64, %60 : vector<8x256xf32>
      %66 = math.absf %65 : vector<8x256xf32>
      %cst_26 = arith.constant 5.000000e+00 : f32
      %67 = vector.broadcast %cst_26 : f32 to vector<8x256xf32>
      %68 = arith.mulf %67, %66 : vector<8x256xf32>
      %cst_27 = arith.constant 1.000000e+00 : f32
      %69 = vector.broadcast %cst_27 : f32 to vector<8x256xf32>
      %70 = arith.addf %69, %68 : vector<8x256xf32>
      %71 = math.absf %58 : vector<8x256xf32>
      %cst_28 = arith.constant 0.000000e+00 : f32
      %72 = vector.broadcast %cst_28 : f32 to vector<8x256xf32>
      %73 = arith.subf %72, %71 : vector<8x256xf32>
      %74 = math.exp %73 : vector<8x256xf32>
      %cst_29 = arith.constant 1.000000e+00 : f32
      %75 = vector.broadcast %cst_29 : f32 to vector<8x256xf32>
      %76 = arith.addf %75, %74 : vector<8x256xf32>
      %77 = tpu.reciprocal %76 {approx = true} : vector<8x256xf32> -> vector<8x256xf32>
      %cst_30 = arith.constant 0.000000e+00 : f32
      %78 = vector.broadcast %cst_30 : f32 to vector<8x256xf32>
      %79 = arith.cmpf oge, %58, %78 : vector<8x256xf32>
      %80 = arith.mulf %74, %77 : vector<8x256xf32>
      %81 = arith.select %79, %77, %80 : vector<8x256xi1>, vector<8x256xf32>
      %cst_31 = arith.constant 0.000000e+00 : f32
      %82 = vector.broadcast %cst_31 : f32 to vector<8x256xf32>
      %83 = arith.maximumf %58, %82 : vector<8x256xf32>
      %84 = arith.mulf %58, %60 : vector<8x256xf32>
      %85 = arith.subf %83, %84 : vector<8x256xf32>
      %86 = math.log %76 : vector<8x256xf32>
      %87 = arith.addf %85, %86 : vector<8x256xf32>
      %88 = arith.addf %47, %87 : vector<8x256xf32>
      %89 = arith.mulf %81, %60 : vector<8x256xf32>
      %90 = arith.mulf %89, %70 : vector<8x256xf32>
      %91 = arith.addf %50, %90 : vector<8x256xf32>
      %92 = arith.addf %81, %60 : vector<8x256xf32>
      %93 = arith.mulf %92, %70 : vector<8x256xf32>
      %94 = arith.addf %53, %93 : vector<8x256xf32>
      %c16_i32 = arith.constant 16 : i32
      %95 = arith.addi %3, %c16_i32 : i32
      %96 = tpu.assume_multiple %95, 8 : i32
      %c0_32 = arith.constant 0 : index
      %97 = arith.index_cast %96 : i32 to index
      %c0_33 = arith.constant 0 : index
      %98 = vector.load %arg1[%c0_32, %97, %c0_33] : memref<1x128x256xf32, #tpu.memory_space<vmem>>, vector<1x8x256xf32>
      %99 = vector.shape_cast %98 : vector<1x8x256xf32> to vector<8x256xf32>
      %100 = vector.extract_strided_slice %6 {offsets = [16, 0], sizes = [8, 256], strides = [1, 1]} : vector<32x256xbf16> to vector<8x256xbf16>
      %101 = arith.extf %100 : vector<8x256xbf16> to vector<8x256xf32>
      %c16 = arith.constant 16 : index
      %c0_34 = arith.constant 0 : index
      %102 = vector.load %arg3[%c16, %c0_34] : memref<32x32xbf16, #tpu.memory_space<vmem>>, vector<8x32xbf16>
      %cst_35 = arith.constant dense<0.000000e+00> : vector<8x256xf32>
      %103 = tpu.matmul %102, %9, %cst_35 {dimension_numbers = #tpu.dot_dimension_numbers<[1], [0], [0], [1], [0, 0, 1, 1], [], []>} : vector<8x32xbf16>, vector<32x256xbf16>, vector<8x256xf32> -> vector<8x256xf32>
      %cst_36 = arith.constant 0.00104058278 : f32
      %104 = vector.broadcast %cst_36 : f32 to vector<8x256xf32>
      %105 = arith.mulf %103, %104 : vector<8x256xf32>
      %106 = arith.subf %105, %101 : vector<8x256xf32>
      %107 = math.absf %106 : vector<8x256xf32>
      %cst_37 = arith.constant 5.000000e+00 : f32
      %108 = vector.broadcast %cst_37 : f32 to vector<8x256xf32>
      %109 = arith.mulf %108, %107 : vector<8x256xf32>
      %cst_38 = arith.constant 1.000000e+00 : f32
      %110 = vector.broadcast %cst_38 : f32 to vector<8x256xf32>
      %111 = arith.addf %110, %109 : vector<8x256xf32>
      %112 = math.absf %99 : vector<8x256xf32>
      %cst_39 = arith.constant 0.000000e+00 : f32
      %113 = vector.broadcast %cst_39 : f32 to vector<8x256xf32>
      %114 = arith.subf %113, %112 : vector<8x256xf32>
      %115 = math.exp %114 : vector<8x256xf32>
      %cst_40 = arith.constant 1.000000e+00 : f32
      %116 = vector.broadcast %cst_40 : f32 to vector<8x256xf32>
      %117 = arith.addf %116, %115 : vector<8x256xf32>
      %118 = tpu.reciprocal %117 {approx = true} : vector<8x256xf32> -> vector<8x256xf32>
      %cst_41 = arith.constant 0.000000e+00 : f32
      %119 = vector.broadcast %cst_41 : f32 to vector<8x256xf32>
      %120 = arith.cmpf oge, %99, %119 : vector<8x256xf32>
      %121 = arith.mulf %115, %118 : vector<8x256xf32>
      %122 = arith.select %120, %118, %121 : vector<8x256xi1>, vector<8x256xf32>
      %cst_42 = arith.constant 0.000000e+00 : f32
      %123 = vector.broadcast %cst_42 : f32 to vector<8x256xf32>
      %124 = arith.maximumf %99, %123 : vector<8x256xf32>
      %125 = arith.mulf %99, %101 : vector<8x256xf32>
      %126 = arith.subf %124, %125 : vector<8x256xf32>
      %127 = math.log %117 : vector<8x256xf32>
      %128 = arith.addf %126, %127 : vector<8x256xf32>
      %129 = arith.addf %88, %128 : vector<8x256xf32>
      %130 = arith.mulf %122, %101 : vector<8x256xf32>
      %131 = arith.mulf %130, %111 : vector<8x256xf32>
      %132 = arith.addf %91, %131 : vector<8x256xf32>
      %133 = arith.addf %122, %101 : vector<8x256xf32>
      %134 = arith.mulf %133, %111 : vector<8x256xf32>
      %135 = arith.addf %94, %134 : vector<8x256xf32>
      %c24_i32 = arith.constant 24 : i32
      %136 = arith.addi %3, %c24_i32 : i32
      %137 = tpu.assume_multiple %136, 8 : i32
      %c0_43 = arith.constant 0 : index
      %138 = arith.index_cast %137 : i32 to index
      %c0_44 = arith.constant 0 : index
      %139 = vector.load %arg1[%c0_43, %138, %c0_44] : memref<1x128x256xf32, #tpu.memory_space<vmem>>, vector<1x8x256xf32>
      %140 = vector.shape_cast %139 : vector<1x8x256xf32> to vector<8x256xf32>
      %141 = vector.extract_strided_slice %6 {offsets = [24, 0], sizes = [8, 256], strides = [1, 1]} : vector<32x256xbf16> to vector<8x256xbf16>
      %142 = arith.extf %141 : vector<8x256xbf16> to vector<8x256xf32>
      %c24 = arith.constant 24 : index
      %c0_45 = arith.constant 0 : index
      %143 = vector.load %arg3[%c24, %c0_45] : memref<32x32xbf16, #tpu.memory_space<vmem>>, vector<8x32xbf16>
      %cst_46 = arith.constant dense<0.000000e+00> : vector<8x256xf32>
      %144 = tpu.matmul %143, %9, %cst_46 {dimension_numbers = #tpu.dot_dimension_numbers<[1], [0], [0], [1], [0, 0, 1, 1], [], []>} : vector<8x32xbf16>, vector<32x256xbf16>, vector<8x256xf32> -> vector<8x256xf32>
      %cst_47 = arith.constant 0.00104058278 : f32
      %145 = vector.broadcast %cst_47 : f32 to vector<8x256xf32>
      %146 = arith.mulf %144, %145 : vector<8x256xf32>
      %147 = arith.subf %146, %142 : vector<8x256xf32>
      %148 = math.absf %147 : vector<8x256xf32>
      %cst_48 = arith.constant 5.000000e+00 : f32
      %149 = vector.broadcast %cst_48 : f32 to vector<8x256xf32>
      %150 = arith.mulf %149, %148 : vector<8x256xf32>
      %cst_49 = arith.constant 1.000000e+00 : f32
      %151 = vector.broadcast %cst_49 : f32 to vector<8x256xf32>
      %152 = arith.addf %151, %150 : vector<8x256xf32>
      %153 = math.absf %140 : vector<8x256xf32>
      %cst_50 = arith.constant 0.000000e+00 : f32
      %154 = vector.broadcast %cst_50 : f32 to vector<8x256xf32>
      %155 = arith.subf %154, %153 : vector<8x256xf32>
      %156 = math.exp %155 : vector<8x256xf32>
      %cst_51 = arith.constant 1.000000e+00 : f32
      %157 = vector.broadcast %cst_51 : f32 to vector<8x256xf32>
      %158 = arith.addf %157, %156 : vector<8x256xf32>
      %159 = tpu.reciprocal %158 {approx = true} : vector<8x256xf32> -> vector<8x256xf32>
      %cst_52 = arith.constant 0.000000e+00 : f32
      %160 = vector.broadcast %cst_52 : f32 to vector<8x256xf32>
      %161 = arith.cmpf oge, %140, %160 : vector<8x256xf32>
      %162 = arith.mulf %156, %159 : vector<8x256xf32>
      %163 = arith.select %161, %159, %162 : vector<8x256xi1>, vector<8x256xf32>
      %cst_53 = arith.constant 0.000000e+00 : f32
      %164 = vector.broadcast %cst_53 : f32 to vector<8x256xf32>
      %165 = arith.maximumf %140, %164 : vector<8x256xf32>
      %166 = arith.mulf %140, %142 : vector<8x256xf32>
      %167 = arith.subf %165, %166 : vector<8x256xf32>
      %168 = math.log %158 : vector<8x256xf32>
      %169 = arith.addf %167, %168 : vector<8x256xf32>
      %170 = arith.addf %129, %169 : vector<8x256xf32>
      %171 = arith.mulf %163, %142 : vector<8x256xf32>
      %172 = arith.mulf %171, %152 : vector<8x256xf32>
      %173 = arith.addf %132, %172 : vector<8x256xf32>
      %174 = arith.addf %163, %142 : vector<8x256xf32>
      %175 = arith.mulf %174, %152 : vector<8x256xf32>
      %176 = arith.addf %135, %175 : vector<8x256xf32>
      %cst_54 = arith.constant dense<0.000000e+00> : vector<256xf32>
      %177 = vector.multi_reduction <add>, %170, %cst_54 [0] : vector<8x256xf32> to vector<256xf32>
      %178 = vector.shape_cast %177 : vector<256xf32> to vector<1x256xf32>
      %cst_55 = arith.constant dense<0.000000e+00> : vector<256xf32>
      %179 = vector.multi_reduction <add>, %173, %cst_55 [0] : vector<8x256xf32> to vector<256xf32>
      %180 = vector.shape_cast %179 : vector<256xf32> to vector<1x256xf32>
      %cst_56 = arith.constant dense<0.000000e+00> : vector<256xf32>
      %181 = vector.multi_reduction <add>, %176, %cst_56 [0] : vector<8x256xf32> to vector<256xf32>
      %182 = vector.shape_cast %181 : vector<256xf32> to vector<1x256xf32>
      %183 = tpu.concatenate %178, %180, %182, %0 in 0 : vector<1x256xf32>, vector<1x256xf32>, vector<1x256xf32>, vector<5x256xf32> -> vector<8x256xf32>
      %c8_i32_57 = arith.constant 8 : i32
      %184 = arith.muli %c8_i32_57, %arg6 : i32
      %185 = tpu.assume_multiple %184, 8 : i32
      %c0_58 = arith.constant 0 : index
      %186 = arith.index_cast %185 : i32 to index
      %c0_59 = arith.constant 0 : index
      %187 = vector.load %arg5[%c0_58, %186, %c0_59] : memref<1x32x256xf32, #tpu.memory_space<vmem>>, vector<1x8x256xf32>
      %188 = vector.shape_cast %187 : vector<1x8x256xf32> to vector<8x256xf32>
      %189 = vector.shape_cast %183 : vector<8x256xf32> to vector<1x8x256xf32>
      tpu.vector_store %arg5[%c0_58, %186, %c0_59], %189 {strides = array<i32>} : memref<1x32x256xf32, #tpu.memory_space<vmem>>, vector<1x8x256xf32>,
    }
    %c4_i32_0 = arith.constant 4 : i32
    return
  }
  func.func @transform_0(%arg0: i32) -> (i32, i32, i32) {
    %c0_i32 = arith.constant 0 : i32
    %c0_i32_0 = arith.constant 0 : i32
    %c0_i32_1 = arith.constant 0 : i32
    return %arg0, %c0_i32, %c0_i32_0 : i32, i32, i32
  }
  func.func @transform_1(%arg0: i32) -> (i32, i32, i32) {
    %c0_i32 = arith.constant 0 : i32
    %c0_i32_0 = arith.constant 0 : i32
    %c0_i32_1 = arith.constant 0 : i32
    return %arg0, %c0_i32, %c0_i32_0 : i32, i32, i32
  }
  func.func @transform_2(%arg0: i32) -> (i32, i32) {
    %c0_i32 = arith.constant 0 : i32
    %c0_i32_0 = arith.constant 0 : i32
    %c0_i32_1 = arith.constant 0 : i32
    return %c0_i32, %c0_i32_0 : i32, i32
  }
  func.func @transform_3(%arg0: i32) -> (i32, i32) {
    %c0_i32 = arith.constant 0 : i32
    %c0_i32_0 = arith.constant 0 : i32
    %c0_i32_1 = arith.constant 0 : i32
    return %c0_i32, %c0_i32_0 : i32, i32
  }
  func.func @transform_4(%arg0: i32) -> (i32, i32, i32) {
    %c0_i32 = arith.constant 0 : i32
    %c0_i32_0 = arith.constant 0 : i32
    %c0_i32_1 = arith.constant 0 : i32
    return %arg0, %c0_i32, %c0_i32_0 : i32, i32, i32
  }
}

</mosaic_0001>

<bundles_post_ra>
// kernel: structure_loss.1
= control target key start
LH: loop header
LB: loop body
LE: loop exit
PB: predicated region body
PF: predicated region fallthrough
CT: control target
= control target key end

     0   :  { %s1312_s15 = smov 0   ;;  %s1664_s0 = inlined_call_operand.vmem [shape: f32[2,128,256], index: 0, kind: input, shape index: {}]   ;;  %s1665_s1 = inlined_call_operand.vmem [shape: bf16[2,128,256], index: 1, kind: input, shape index: {}]   ;;  %s1666_s2 = inlined_call_operand.vmem [shape: bf16[32,32], index: 2, kind: input, shape index: {}]   ;;  %s1667_s3 = inlined_call_operand.vmem [shape: bf16[256,256], index: 3, kind: input, shape index: {}]   ;;  %s1668_s4 = inlined_call_operand.vmem [shape: f32[2,32,256], index: 4, kind: output, shape index: {}]  }
   0x1 LB: > { %s1077_s16 = sadd.s32 4294967295, %s1280_s15   ;;  %p1081_p0 = scmp.ge.s32.totalorder %s1280_s15, 1  ;;  %s1280_s15 = sphi %s1312_s15, %s14_s15  }
   0x2   : > { %p172_p1 = scmp.lt.s32.totalorder %s1280_s15, 3 }
   0x4   : > { %p173_p2 = pnand %p1081_p0, %p172_p1 }
   0x5   : > { %p203_p3 = scmp.lt.s32.totalorder (!%p173_p2), %s1077_s16, 1  ;;  %s1335_s29 = smov (!%p173_p2), 0  }
   0x6   : > { %176 = sbr.rel (%p173_p2) target bundleno = 547 (0x223), region = 36 }
   0xb   : > { %s1670_s16 = smov (!%p203_p3, %s1077_s16), 1 }
   0xc   : > { %s1144_s17 = sshll.u32 %s1670_s16, 8  ;;  %s1145_s18 = sshll.u32 %s1670_s16, 7 }
   0xd   : > { %s1323_s21 = scalar_lea.vmem %s1664_s0, %s1144_s17  ;;  %s1328_s24 = scalar_lea.vmem %s1665_s1, %s1145_s18 }
   0xe   : > { %s1146_s25 = sshll.u32 %s1670_s16, 6 }
   0xf   : > { %s1333_s28 = scalar_lea.vmem %s1668_s4, %s1146_s25 }
  0x10 LB: >> { %v1170_v0 = vld [vmem:[%s1667_s3 + $0x74] ss:$8 sps:$4 sm:$0xff]   ;;  %v1172_v1 = vld [vmem:[%s1667_s3 + $0x70] ss:$8 sps:$4 sm:$0xff]   ;;  %v1173_v2 = vld [vmem:[%s1667_s3 + $0x64] ss:$8 sps:$4 sm:$0xff]   ;;  %s1284_s29 = sphi %s1335_s29, %s224_s29  }
  0x11   : >> { %447 = vmatprep.subr.bf16.mxu0 %v1170_v0  ;;  %v1175_v3 = vld [vmem:[%s1667_s3 + $0x60] ss:$8 sps:$4 sm:$0xff]   ;;  %v1176_v4 = vld [vmem:[%s1667_s3 + $0x54] ss:$8 sps:$4 sm:$0xff]   ;;  %v1178_v5 = vld [vmem:[%s1667_s3 + $0x50] ss:$8 sps:$4 sm:$0xff]  }
  0x12   : >> { %448 = vmatpush1.bf16.msra.mxu0 %v1172_v1  ;;  %v1179_v6 = vld [vmem:[%s1667_s3 + $0x44] ss:$8 sps:$4 sm:$0xff]   ;;  %v1181_v7 = vld [vmem:[%s1667_s3 + $0x40] ss:$8 sps:$4 sm:$0xff]   ;;  %v1182_v8 = vld [vmem:[%s1667_s3 + $0x34] ss:$8 sps:$4 sm:$0xff]  }
  0x13   : >> { %449 = vmatprep.subr.bf16.mxu0 %v1173_v2  ;;  %v1184_v9 = vld [vmem:[%s1667_s3 + $0x30] ss:$8 sps:$4 sm:$0xff]   ;;  %s1371_s27 = sshll.u32 %s1284_s29, 5  ;;  %v1185_v10 = vld [vmem:[%s1667_s3 + $0x24] ss:$8 sps:$4 sm:$0xff]   ;;  %v1286_v40 = vmov 0  }
  0x14   : >> { %s1378_s6 = scalar_lea.vmem %s1328_s24, %s1371_s27  ;;  %v1187_v11 = vld [vmem:[%s1667_s3 + $0x20] ss:$8 sps:$4 sm:$0xff]   ;;  %v1188_v12 = vld [vmem:[%s1667_s3 + $0x14] ss:$8 sps:$4 sm:$0xff]   ;;  %v1190_v16 = vld [vmem:[%s1667_s3 + $0x10] ss:$8 sps:$4 sm:$0xff]   ;;  %550 = vmatprep.mubr.bf16.mxu1 %v1286_v40 }
  0x15   : >> { %v1387_v13 = vld [vmem:[%s1378_s6] sm:$0xff]  ;;  %v1390_v14 = vld [vmem:[%s1378_s6 + $0x8] sm:$0xff]  ;;  %v1194_v19 = vld [vmem:[%s1667_s3 + $0xf4] ss:$8 sps:$4 sm:$0xff]   ;;  %vm514_vm0 = vcmask 261120   ;;  %s504_s19 = sshra.s32 %s1371_s27, 3 }
  0x16   : >> { %450 = vmatpush1.bf16.msra.mxu0 %v1175_v3  ;;  %v1092_v15 = vcombine.high %v1387_v13, %v1390_v14  ;;  %v1191_v17 = vld [vmem:[%s1667_s3 + $0x4] ss:$8 sps:$4 sm:$0xff]   ;;  %v1193_v18 = vld [vmem:[%s1667_s3] ss:$8 sps:$4 sm:$0xff]   ;;  %v1196_v20 = vld [vmem:[%s1667_s3 + $0xf0] ss:$8 sps:$4 sm:$0xff]   ;;  %v1091_v37 = vcombine.low %v1387_v13, %v1390_v14 }
  0x17   : >> { %451 = vmatprep.subr.bf16.mxu0 %v1176_v4  ;;  %v1197_v21 = vld [vmem:[%s1667_s3 + $0xe4] ss:$8 sps:$4 sm:$0xff]   ;;  %v1199_v22 = vld [vmem:[%s1667_s3 + $0xe0] ss:$8 sps:$4 sm:$0xff]   ;;  %v1200_v23 = vld [vmem:[%s1667_s3 + $0xd4] ss:$8 sps:$4 sm:$0xff]  }
  0x18   : >> { %479 = vmatprep.mubr.bf16.mxu0 %v1092_v15  ;;  %v1202_v24 = vld [vmem:[%s1667_s3 + $0xd0] ss:$8 sps:$4 sm:$0xff]   ;;  %v1203_v25 = vld [vmem:[%s1667_s3 + $0xc4] ss:$8 sps:$4 sm:$0xff]   ;;  %v1205_v26 = vld [vmem:[%s1667_s3 + $0xc0] ss:$8 sps:$4 sm:$0xff]  }
  0x19   : >> { %v1206_v27 = vld [vmem:[%s1667_s3 + $0xb4] ss:$8 sps:$4 sm:$0xff]   ;;  %v1208_v28 = vld [vmem:[%s1667_s3 + $0xb0] ss:$8 sps:$4 sm:$0xff]   ;;  %v1209_v29 = vld [vmem:[%s1667_s3 + $0xa4] ss:$8 sps:$4 sm:$0xff]  }
  0x1a   : >> { %452 = vmatpush1.bf16.msra.mxu0 %v1178_v5  ;;  %v1211_v30 = vld [vmem:[%s1667_s3 + $0xa0] ss:$8 sps:$4 sm:$0xff]   ;;  %v1212_v31 = vld [vmem:[%s1667_s3 + $0x94] ss:$8 sps:$4 sm:$0xff]   ;;  %v1214_v32 = vld [vmem:[%s1667_s3 + $0x90] ss:$8 sps:$4 sm:$0xff]  }
  0x1b   : >> { %453 = vmatprep.subr.bf16.mxu0 %v1179_v6  ;;  %v1215_v33 = vld [vmem:[%s1667_s3 + $0x84] ss:$8 sps:$4 sm:$0xff]   ;;  %v1217_v34 = vld [vmem:[%s1667_s3 + $0x80] ss:$8 sps:$4 sm:$0xff]   ;;  %v1452_v35 = vld [vmem:[%s1378_s6 + $0x10] sm:$0xff]  ;;  %s1148_s20 = sshll.u32 %s504_s19, 4 }
  0x1c   : >> { %v1455_v36 = vld [vmem:[%s1378_s6 + $0x18] sm:$0xff]  ;;  %v513_v53 = vld [vmem:[%s1666_s2] sm:$0xf]  ;;  %v623_v54 = vld [vmem:[%s1666_s2 + $0x4] sm:$0xf]  ;;  %s508_s22 = scalar_lea.vmem %s1323_s21, %s1148_s20  ;;  %s613_s23 = sadd.s32 8, %s1371_s27 }
  0x1d   : >> { %v1094_v38 = vcombine.high %v1452_v35, %v1455_v36  ;;  %v1093_v39 = vcombine.low %v1452_v35, %v1455_v36  ;;  %v732_v55 = vld [vmem:[%s1666_s2 + $0x8] sm:$0xf]  ;;  %v841_v56 = vld [vmem:[%s1666_s2 + $0xc] sm:$0xf]  ;;  %s614_s25 = sshra.s32 %s613_s23, 3  ;;  %v1482_v57 = vld [vmem:[%s508_s22] sm:$0xff] }
  0x1e   : >> { %454 = vmatpush1.bf16.msra.mxu0 %v1181_v7  ;;  %s1149_s26 = sshll.u32 %s614_s25, 4  ;;  %v569_v58 = vand.u32 2147483647, %v1482_v57  ;;  %v1485_v59 = vld [vmem:[%s508_s22 + $0x8] sm:$0xff]  ;;  %s722_s5 = sadd.s32 16, %s1371_s27  ;;  %vm581_vm1 = vcmp.ge.f32.partialorder %v1482_v57, 0.0 }
  0x1f   : >> { %455 = vmatprep.subr.bf16.mxu0 %v1182_v8  ;;  %s618_s30 = scalar_lea.vmem %s1323_s21, %s1149_s26  ;;  %v570_v60 = vand.u32 2147483647, %v1485_v59  ;;  %s723_s7 = sshra.s32 %s722_s5, 3  ;;  %vm582_vm2 = vcmp.ge.f32.partialorder %v1485_v59, 0.0  ;;  %vm976_vm9 = vcmask 1040384   ;;  %vm979_vm10 = vcmask 1041408  }
  0x20   : >> { %v1489_v61 = vld [vmem:[%s618_s30] sm:$0xff]  ;;  %v571_v62 = vsub.f32 0.0, %v569_v58  ;;  %v1492_v0 = vld [vmem:[%s618_s30 + $0x8] sm:$0xff]  ;;  %s831_s8 = sadd.s32 24, %s1371_s27  ;;  %s1150_s9 = sshll.u32 %s723_s7, 4  ;;  %vm982_vm11 = vcmask 1042432  }
  0x21   : >> { %v678_v63 = vand.u32 2147483647, %v1489_v61  ;;  %v572_v1 = vsub.f32 0.0, %v570_v60  ;;  %v679_v3 = vand.u32 2147483647, %v1492_v0  ;;  %s832_s10 = sshra.s32 %s831_s8, 3  ;;  %s727_s6 = scalar_lea.vmem %s1323_s21, %s1150_s9 }
  0x22   : >> { %456 = vmatpush1.bf16.msra.mxu0 %v1184_v9  ;;  %v573_v2 = vmul.f32 1.442695, %v571_v62  ;;  %s1151_s11 = sshll.u32 %s832_s10, 4  ;;  %vm690_vm3 = vcmp.ge.f32.partialorder %v1489_v61, 0.0  ;;  %vm691_vm4 = vcmp.ge.f32.partialorder %v1492_v0, 0.0  ;;  %s1139_s27 = sshll.u32 %s1284_s29, 3 }
  0x23   : >> { %457 = vmatprep.subr.bf16.mxu0 %v1185_v10  ;;  %v680_v4 = vsub.f32 0.0, %v678_v63  ;;  %v575_v5 = vmul.f32 1.442695, %v572_v1  ;;  %v681_v6 = vsub.f32 0.0, %v679_v3  ;;  %s836_s12 = scalar_lea.vmem %s1323_s21, %s1151_s11  ;;  %s986_s13 = sshra.s32 %s1139_s27, 3 }
  0x24   : >> { %1222 = vpow2.f32 %v573_v2  ;;  %s1152_s14 = sshll.u32 %s986_s13, 4  ;;  %s224_s29 = sadd.s32 1, %s1284_s29  }
  0x25   : >> { %v682_v7 = vmul.f32 1.442695, %v680_v4  ;;  %1224 = vpow2.f32 %v575_v5  ;;  %v684_v8 = vmul.f32 1.442695, %v681_v6  ;;  %s990_s16 = scalar_lea.vmem %s1333_s28, %s1152_s14  ;;  %p221_p4 = scmp.ge.s32.totalorder %s224_s29, 4  }
  0x26   : >> { %458 = vmatpush1.bf16.msra.mxu0 %v1187_v11 }
  0x27   : >> { %459 = vmatprep.subr.bf16.mxu0 %v1188_v12  ;;  %1226 = vpow2.f32 %v682_v7 }
  0x28   : >> { %1228 = vpow2.f32 %v684_v8 }
  0x2a   : >> { %460 = vmatpush1.bf16.msra.mxu0 %v1190_v16 }
  0x2b   : >> { %461 = vmatprep.subr.bf16.mxu0 %v1191_v17 }
  0x2e   : >> { %462 = vmatpush1.bf16.msra.mxu0 %v1193_v18 }
  0x2f   : >> { %463 = vmatprep.subr.bf16.mxu0 %v1194_v19  ;;  %v1520_v19 = vunpack.c.l.bf16 %v1387_v13 }
  0x31   : >> { %v1495_v9 = vpop.eup %1222 }
  0x32   : >> { %464 = vmatpush2.bf16.msra.mxu0 %v1196_v20  ;;  %v1497_v10 = vpop.eup %1224  ;;  %v1500_v11 = vadd.f32 1.0, %v1495_v9  ;;  %v1523_v20 = vunpack.c.l.bf16 %v1390_v14 }
  0x33   : >> { %465 = vmatprep.subr.bf16.mxu0 %v1197_v21  ;;  %v1506_v15 = vadd.f32 1.0, %v1497_v10  ;;  %v587_v21 = vmax.f32 %v1482_v57, 0.0 }
  0x34   : >> { %1230 = vlog2.f32 %v1500_v11  ;;  %v1503_v12 = vpop.eup %1226 }
  0x35   : >> { %1232 = vlog2.f32 %v1506_v15  ;;  %v1509_v16 = vpop.eup %1228  ;;  %v1512_v17 = vadd.f32 1.0, %v1503_v12 }
  0x36   : >> { %466 = vmatpush2.bf16.msra.mxu0 %v1199_v22  ;;  %v1516_v18 = vadd.f32 1.0, %v1509_v16  ;;  %v589_v22 = vmul.f32 %v1520_v19, %v1482_v57 }
  0x37   : >> { %467 = vmatprep.subr.bf16.mxu0 %v1200_v23  ;;  %1234 = vlog2.f32 %v1512_v17 }
  0x38   : >> { %1236 = vlog2.f32 %v1516_v18 }
  0x3a   : >> { %468 = vmatpush2.bf16.msra.mxu0 %v1202_v24  ;;  %v1529_v24 = vunpack.c.h.bf16 %v1387_v13 }
  0x3b   : >> { %469 = vmatprep.subr.bf16.mxu0 %v1203_v25  ;;  %v696_v25 = vmax.f32 %v1489_v61, 0.0 }
  0x3e   : >> { %470 = vmatpush2.bf16.msra.mxu0 %v1205_v26  ;;  %v698_v26 = vmul.f32 %v1523_v20, %v1489_v61 }
  0x3f   : >> { %471 = vmatprep.subr.bf16.mxu0 %v1206_v27  ;;  %v1535_v27 = vunpack.c.h.bf16 %v1390_v14 }
  0x41   : >> { %v1231_v23 = vpop.eup %1230  ;;  %v699_v13 = vmul.f32 %v1535_v27, %v1492_v0 }
  0x42   : >> { %472 = vmatpush2.bf16.msra.mxu0 %v1208_v28  ;;  %v588_v28 = vmax.f32 %v1485_v59, 0.0 }
  0x43   : >> { %473 = vmatprep.subr.bf16.mxu0 %v1209_v29  ;;  %v590_v29 = vmul.f32 %v1529_v24, %v1485_v59 }
  0x46   : >> { %474 = vmatpush2.bf16.msra.mxu0 %v1211_v30  ;;  %v1233_v30 = vpop.eup %1232 }
  0x47   : >> { %475 = vmatprep.subr.bf16.mxu0 %v1212_v31  ;;  %v591_v31 = vsub.f32 %v587_v21, %v589_v22  ;;  %v596_v14 = vmul.f32 0.6931472, %v1233_v30 }
  0x4a   : >> { %476 = vmatpush2.bf16.msra.mxu0 %v1214_v32  ;;  %v594_v32 = vmul.f32 0.6931472, %v1231_v23 }
  0x4b   : >> { %477 = vmatprep.subr.bf16.mxu0 %v1215_v33  ;;  %v697_v33 = vmax.f32 %v1492_v0, 0.0 }
  0x4e   : >> { %478 = vmatpush2.bf16.msra.mxu0 %v1217_v34  ;;  %v700_v34 = vsub.f32 %v696_v25, %v698_v26 }
  0x51   : >> { %480 = vmatmul.mubr.bf16.vlgmr.msra.gmra.mxu0 %v1091_v37  ;;  %v1235_v37 = vpop.eup %1234 }
  0x52   : >> { %489 = vmatprep.mubr.bf16.mxu0 %v1094_v38  ;;  %v592_v38 = vsub.f32 %v588_v28, %v590_v29 }
  0x59   : >> { %490 = vmatmul.mubr.bf16.gmra.mxu0 %v1093_v39  ;;  %v597_v39 = vadd.f32 %v594_v32, %v591_v31 }
 0x111   : >> { %v481_v41 = vpop.f32.mrf.mxu0 }
 0x113   : >> { %v483_v42 = vpop.f32.mrf.mxu0 }
 0x115   : >> { %v485_v43 = vpop.f32.mrf.mxu0 }
 0x116   : >> { %v500_v52 = vpack.c.bf16 %v485_v43, %v481_v41  ;;  %v701_v41 = vsub.f32 %v697_v33, %v699_v13 }
 0x117   : >> { %v487_v44 = vpop.f32.mrf.mxu0 }
 0x118   : >> { %v501_v51 = vpack.c.bf16 %v487_v44, %v483_v42  ;;  %v1237_v42 = vpop.eup %1236  ;;  %v598_v44 = vadd.f32 %v596_v14, %v592_v38  ;;  %v1598_v14 = vunpack.c.h.bf16 %v1452_v35 }
 0x119   : >> { %v491_v45 = vpop.f32.mrf.mxu0 }
 0x11b   : >> { %v493_v46 = vpop.f32.mrf.mxu0 }
 0x11d   : >> { %v495_v47 = vpop.f32.mrf.mxu0 }
 0x11e   : >> { %v502_v50 = vpack.c.bf16 %v495_v47, %v491_v45  ;;  %v705_v45 = vmul.f32 0.6931472, %v1237_v42 }
 0x11f   : >> { %v497_v48 = vpop.f32.mrf.mxu0 }
 0x120   : >> { %v503_v49 = vpack.c.bf16 %v497_v48, %v493_v46  ;;  %v707_v47 = vadd.f32 %v705_v45, %v701_v41 }
 0x122   : >> { %530 = vmatprep.subr.bf16.mxu1 %v503_v49  ;;  %v1545_v48 = vadd.f32 %v707_v47, %v598_v44 }
 0x123   : >> { %531 = vmatpush1.bf16.msra.mxu1 %v502_v50 }
 0x124   : >> { %532 = vmatprep.subr.bf16.mxu1 %v501_v51 }
 0x127   : >> { %533 = vmatpush1.bf16.msra.mxu1 %v500_v52 }
 0x128   : >> { %639 = vmatprep.subr.bf16.mxu1 %v503_v49 }
 0x12a   : >> { %1129 = vmatmul.mubr.msk.bf16.vlgmr.msra.gmra.mxu1 %vm514_vm0, %v513_v53 }
 0x12b   : >> { %640 = vmatpush1.bf16.msra.mxu1 %v502_v50  ;;  %659 = vmatprep.mubr.bf16.mxu1 %v1286_v40 }
 0x12c   : >> { %641 = vmatprep.subr.bf16.mxu1 %v501_v51 }
 0x12f   : >> { %642 = vmatpush1.bf16.msra.mxu1 %v500_v52 }
 0x130   : >> { %748 = vmatprep.subr.bf16.mxu1 %v503_v49 }
 0x132   : >> { %1132 = vmatmul.mubr.msk.bf16.vlgmr.msra.gmra.mxu1 %vm514_vm0, %v623_v54 }
 0x133   : >> { %749 = vmatpush1.bf16.msra.mxu1 %v502_v50  ;;  %768 = vmatprep.mubr.bf16.mxu1 %v1286_v40 }
 0x134   : >> { %750 = vmatprep.subr.bf16.mxu1 %v501_v51 }
 0x137   : >> { %751 = vmatpush1.bf16.msra.mxu1 %v500_v52 }
 0x138   : >> { %857 = vmatprep.subr.bf16.mxu1 %v503_v49  ;;  %v1550_v49 = vld [vmem:[%s727_s6] sm:$0xff] }
 0x139   : >> { %v805_v59 = vmax.f32 %v1550_v49, 0.0  ;;  %vm799_vm5 = vcmp.ge.f32.partialorder %v1550_v49, 0.0 }
 0x13a   : >> { %1135 = vmatmul.mubr.msk.bf16.vlgmr.msra.gmra.mxu1 %vm514_vm0, %v732_v55 }
 0x13b   : >> { %858 = vmatpush1.bf16.msra.mxu1 %v502_v50  ;;  %877 = vmatprep.mubr.bf16.mxu1 %v1286_v40  ;;  %v703_v40 = vmul.f32 0.6931472, %v1235_v37  ;;  %v787_v50 = vand.u32 2147483647, %v1550_v49 }
 0x13c   : >> { %859 = vmatprep.subr.bf16.mxu1 %v501_v51  ;;  %v1554_v51 = vld [vmem:[%s727_s6 + $0x8] sm:$0xff] }
 0x13d   : >> { %v706_v43 = vadd.f32 %v703_v40, %v700_v34  ;;  %v788_v53 = vand.u32 2147483647, %v1554_v51  ;;  %v789_v54 = vsub.f32 0.0, %v787_v50  ;;  %v806_v45 = vmax.f32 %v1554_v51, 0.0 }
 0x13e   : >> { %v808_v0 = vmul.f32 %v1598_v14, %v1554_v51  ;;  %vm800_vm6 = vcmp.ge.f32.partialorder %v1554_v51, 0.0 }
 0x13f   : >> { %860 = vmatpush1.bf16.msra.mxu1 %v500_v52  ;;  %v1543_v46 = vadd.f32 %v706_v43, %v597_v39  ;;  %v1556_v52 = vld [vmem:[%s836_s12] sm:$0xff]  ;;  %v790_v58 = vsub.f32 0.0, %v788_v53  ;;  %v791_v62 = vmul.f32 1.442695, %v789_v54 }
 0x140   : >> { %v896_v55 = vand.u32 2147483647, %v1556_v52  ;;  %vm908_vm7 = vcmp.ge.f32.partialorder %v1556_v52, 0.0 }
 0x141   : >> { %v793_v1 = vmul.f32 1.442695, %v790_v58  ;;  %1238 = vpow2.f32 %v791_v62 }
 0x142   : >> { %1138 = vmatmul.mubr.msk.bf16.vlgmr.msra.gmra.mxu1 %vm514_vm0, %v841_v56  ;;  %v1560_v56 = vld [vmem:[%s836_s12 + $0x8] sm:$0xff]  ;;  %v898_v63 = vsub.f32 0.0, %v896_v55 }
 0x143   : >> { %v897_v60 = vand.u32 2147483647, %v1560_v56  ;;  %1240 = vpow2.f32 %v793_v1  ;;  %vm909_vm8 = vcmp.ge.f32.partialorder %v1560_v56, 0.0 }
 0x144   : >> { %v900_v3 = vmul.f32 1.442695, %v898_v63 }
 0x145   : >> { %v899_v2 = vsub.f32 0.0, %v897_v60 }
 0x146   : >> { %1242 = vpow2.f32 %v900_v3 }
 0x147   : >> { %v902_v4 = vmul.f32 1.442695, %v899_v2  ;;  %1244 = vrcp.f32 %v1500_v11 }
 0x149   : >> { %1246 = vpow2.f32 %v902_v4  ;;  %v1620_v4 = vunpack.c.h.bf16 %v1455_v36 }
 0x14a   : >> { %1248 = vrcp.f32 %v1506_v15 }
 0x14b   : >> { %1250 = vrcp.f32 %v1512_v17 }
 0x14c   : >> { %1252 = vrcp.f32 %v1516_v18 }
 0x14e   : >> { %v1566_v5 = vpop.eup %1238 }
 0x14f   : >> { %v795_v7 = vadd.f32 1.0, %v1566_v5 }
 0x150   : >> { %v1569_v6 = vpop.eup %1240 }
 0x151   : >> { %1254 = vlog2.f32 %v795_v7  ;;  %v796_v22 = vadd.f32 1.0, %v1569_v6 }
 0x152   : >> { %1256 = vrcp.f32 %v795_v7 }
 0x153   : >> { %v1572_v8 = vpop.eup %1242  ;;  %1258 = vlog2.f32 %v796_v22 }
 0x154   : >> { %v1245_v21 = vpop.eup %1244  ;;  %v904_v15 = vadd.f32 1.0, %v1572_v8 }
 0x155   : >> { %v583_v18 = vmul.f32 %v1245_v21, %v1495_v9  ;;  %v1586_v9 = vunpack.c.l.bf16 %v1452_v35  ;;  %v1612_v35 = vunpack.c.l.bf16 %v1455_v36 }
 0x156   : >> { %v1575_v11 = vpop.eup %1246  ;;  %1260 = vlog2.f32 %v904_v15 }
 0x157   : >> { %v1249_v17 = vpop.eup %1248  ;;  %v905_v25 = vadd.f32 1.0, %v1575_v11  ;;  %v585_v32 = vsel %vm581_vm1, %v1245_v21, %v583_v18  ;;  %v807_v38 = vmul.f32 %v1586_v9, %v1550_v49  ;;  %v916_v62 = vmul.f32 %v1612_v35, %v1556_v52 }
 0x158   : >> { %v1251_v23 = vpop.eup %1250  ;;  %v584_v26 = vmul.f32 %v1249_v17, %v1497_v10  ;;  %v607_v41 = vadd.f32 %v585_v32, %v1520_v19  ;;  %v915_v18 = vmax.f32 %v1560_v56, 0.0 }
 0x159   : >> { %1262 = vlog2.f32 %v905_v25  ;;  %v1253_v29 = vpop.eup %1252  ;;  %v692_v31 = vmul.f32 %v1251_v23, %v1503_v12  ;;  %v1594_v12 = vmul.f32 %v585_v32, %v1520_v19  ;;  %v809_v54 = vsub.f32 %v805_v59, %v807_v38 }
 0x15a   : >> { %v586_v34 = vsel %vm582_vm2, %v1249_v17, %v584_v26  ;;  %v693_v37 = vmul.f32 %v1253_v29, %v1509_v16  ;;  %1264 = vrcp.f32 %v796_v22  ;;  %v810_v22 = vsub.f32 %v806_v45, %v808_v0 }
 0x15b   : >> { %v694_v61 = vsel %vm690_vm3, %v1251_v23, %v692_v31  ;;  %v1603_v42 = vmul.f32 %v586_v34, %v1529_v24  ;;  %v1606_v44 = vadd.f32 %v586_v34, %v1529_v24  ;;  %1266 = vrcp.f32 %v904_v15 }
 0x15c   : >> { %v695_v53 = vsel %vm691_vm4, %v1253_v29, %v693_v37  ;;  %1268 = vrcp.f32 %v905_v25  ;;  %v917_v26 = vmul.f32 %v1620_v4, %v1560_v56 }
 0x15d   : >> { %v711_v34 = vmul.f32 %v695_v53, %v1535_v27 }
 0x15e   : >> { %v1255_v39 = vpop.eup %1254 }
 0x15f   : >> { %v1257_v47 = vpop.eup %1256  ;;  %v812_v60 = vmul.f32 0.6931472, %v1255_v39 }
 0x160   : >> { %v1259_v55 = vpop.eup %1258  ;;  %v801_v21 = vmul.f32 %v1257_v47, %v1566_v5 }
 0x161   : >> { %v814_v23 = vmul.f32 0.6931472, %v1259_v55 }
 0x162   : >> { %v803_v37 = vsel %vm799_vm5, %v1257_v47, %v801_v21 }
 0x163   : >> { %v1261_v63 = vpop.eup %1260  ;;  %v816_v39 = vadd.f32 %v814_v23, %v810_v22 }
 0x164   : >> { %v921_v36 = vmul.f32 0.6931472, %v1261_v63 }
 0x165   : >> { %v818_v63 = vadd.f32 %v816_v39, %v1545_v48 }
 0x1ea   : >> { %v552_v28 = vpop.f32.mrf.mxu1 }
 0x1eb   : >> { %v559_v30 = vmul.f32 0.0010405828, %v552_v28  ;;  %v1263_v28 = vpop.eup %1262 }
 0x1ec   : >> { %v554_v33 = vpop.f32.mrf.mxu1 }
 0x1ed   : >> { %v561_v13 = vsub.f32 %v559_v30, %v1520_v19  ;;  %v560_v57 = vmul.f32 0.0010405828, %v554_v33  ;;  %v710_v19 = vmul.f32 %v694_v61, %v1523_v20  ;;  %v815_v30 = vadd.f32 %v812_v60, %v809_v54 }
 0x1ee   : >> { %v556_v10 = vpop.f32.mrf.mxu1 }
 0x1ef   : >> { %v563_v40 = vand.u32 2147483647, %v561_v13  ;;  %v562_v16 = vsub.f32 %v560_v57, %v1529_v24  ;;  %v914_v24 = vmax.f32 %v1556_v52, 0.0  ;;  %v716_v13 = vadd.f32 %v694_v61, %v1523_v20 }
 0x1f0   : >> { %v557_v43 = vpop.f32.mrf.mxu1  ;;  %v717_v10 = vadd.f32 %v695_v53, %v1535_v27 }
 0x1f1   : >> { %v565_v1 = vmul.f32 5.0, %v563_v40  ;;  %v564_v2 = vand.u32 2147483647, %v562_v16  ;;  %v918_v31 = vsub.f32 %v914_v24, %v916_v62  ;;  %v919_v40 = vsub.f32 %v915_v18, %v917_v26  ;;  %v1265_v43 = vpop.eup %1264 }
 0x1f2   : >> { %v661_v50 = vpop.f32.mrf.mxu1  ;;  %v923_v16 = vmul.f32 0.6931472, %v1263_v28  ;;  %v802_v62 = vmul.f32 %v1265_v43, %v1569_v6 }
 0x1f3   : >> { %v668_v58 = vmul.f32 0.0010405828, %v661_v50  ;;  %v567_v32 = vadd.f32 1.0, %v565_v1  ;;  %v566_v33 = vmul.f32 5.0, %v564_v2  ;;  %v924_v61 = vadd.f32 %v921_v36, %v918_v31 }
 0x1f4   : >> { %v663_v3 = vpop.f32.mrf.mxu1  ;;  %v925_v2 = vadd.f32 %v923_v16, %v919_v40 }
 0x1f5   : >> { %v670_v7 = vsub.f32 %v668_v58, %v1523_v20  ;;  %v669_v15 = vmul.f32 0.0010405828, %v663_v3  ;;  %v817_v20 = vadd.f32 %v815_v30, %v1543_v46  ;;  %v603_v50 = vmul.f32 %v1594_v12, %v567_v32  ;;  %v1267_v46 = vpop.eup %1266 }
 0x1f6   : >> { %v665_v17 = vpop.f32.mrf.mxu1  ;;  %v609_v54 = vmul.f32 %v607_v41, %v567_v32  ;;  %v568_v55 = vadd.f32 1.0, %v566_v33  ;;  %v1269_v6 = vpop.eup %1268  ;;  %v910_v30 = vmul.f32 %v1267_v46, %v1572_v8  ;;  %v804_v32 = vsel %vm800_vm6, %v1265_v43, %v802_v62 }
 0x1f7   : >> { %v672_v29 = vand.u32 2147483647, %v670_v7  ;;  %v671_v5 = vsub.f32 %v669_v15, %v1535_v27  ;;  %v926_v48 = vadd.f32 %v924_v61, %v817_v20  ;;  %v820_v52 = vmul.f32 %v804_v32, %v1598_v14 }
 0x1f8   : >> { %v666_v25 = vpop.f32.mrf.mxu1  ;;  %v604_v21 = vmul.f32 %v1603_v42, %v568_v55  ;;  %v927_v42 = vadd.f32 %v925_v2, %v818_v63 }
 0x1f9   : >> { %v674_v57 = vmul.f32 5.0, %v672_v29  ;;  %v673_v59 = vand.u32 2147483647, %v671_v5  ;;  %v940_v51 = vrot.slane %v926_v48, 4  ;;  %v911_v25 = vmul.f32 %v1269_v6, %v1575_v11 }
 0x1fa   : >> { %v770_v38 = vpop.f32.mrf.mxu1  ;;  %v946_v39 = vrot.slane %v927_v42, 4 }
 0x1fb   : >> { %v676_v45 = vadd.f32 1.0, %v674_v57  ;;  %v777_v0 = vmul.f32 0.0010405828, %v770_v38  ;;  %v675_v58 = vmul.f32 5.0, %v673_v59  ;;  %v825_v57 = vadd.f32 %v803_v37, %v1586_v9 }
 0x1fc   : >> { %v772_v27 = vpop.f32.mrf.mxu1  ;;  %v826_v38 = vadd.f32 %v804_v32, %v1598_v14 }
 0x1fd   : >> { %v712_v53 = vmul.f32 %v710_v19, %v676_v45  ;;  %v718_v49 = vmul.f32 %v716_v13, %v676_v45  ;;  %v779_v47 = vsub.f32 %v777_v0, %v1586_v9  ;;  %v778_v60 = vmul.f32 0.0010405828, %v772_v27 }
 0x1fe   : >> { %v677_v24 = vadd.f32 1.0, %v675_v58  ;;  %v774_v1 = vpop.f32.mrf.mxu1  ;;  %v610_v19 = vmul.f32 %v1606_v44, %v568_v55  ;;  %v819_v44 = vmul.f32 %v803_v37, %v1586_v9  ;;  %v941_v0 = vadd.f32 %v940_v51, %v926_v48 }
 0x1ff   : >> { %v714_v3 = vadd.f32 %v712_v53, %v603_v50  ;;  %v720_v7 = vadd.f32 %v718_v49, %v609_v54  ;;  %v781_v12 = vand.u32 2147483647, %v779_v47  ;;  %v780_v41 = vsub.f32 %v778_v60, %v1598_v14 }
 0x200   : >> { %v713_v22 = vmul.f32 %v711_v34, %v677_v24  ;;  %v719_v15 = vmul.f32 %v717_v10, %v677_v24  ;;  %v775_v17 = vpop.f32.mrf.mxu1  ;;  %v912_v34 = vsel %vm908_vm7, %v1267_v46, %v910_v30  ;;  %v913_v9 = vsel %vm909_vm8, %v1269_v6, %v911_v25 }
 0x201   : >> { %v783_v23 = vmul.f32 5.0, %v781_v12  ;;  %v782_v18 = vand.u32 2147483647, %v780_v41  ;;  %v928_v11 = vmul.f32 %v912_v34, %v1612_v35  ;;  %v934_v56 = vadd.f32 %v912_v34, %v1612_v35 }
 0x202   : >> { %v715_v26 = vadd.f32 %v713_v22, %v604_v21  ;;  %v721_v28 = vadd.f32 %v719_v15, %v610_v19  ;;  %v879_v29 = vpop.f32.mrf.mxu1  ;;  %v947_v55 = vadd.f32 %v946_v39, %v927_v42  ;;  %v929_v27 = vmul.f32 %v913_v9, %v1620_v4 }
 0x203   : >> { %v784_v31 = vmul.f32 5.0, %v782_v18  ;;  %v886_v36 = vmul.f32 0.0010405828, %v879_v29  ;;  %v785_v13 = vadd.f32 1.0, %v783_v23  ;;  %v935_v53 = vadd.f32 %v913_v9, %v1620_v4 }
 0x204   : >> { %v881_v33 = vpop.f32.mrf.mxu1  ;;  %v942_v47 = vrot.slane %v941_v0, 2 }
 0x205   : >> { %v888_v5 = vsub.f32 %v886_v36, %v1612_v35  ;;  %v887_v10 = vmul.f32 0.0010405828, %v881_v33  ;;  %v786_v59 = vadd.f32 1.0, %v784_v31  ;;  %v821_v45 = vmul.f32 %v819_v44, %v785_v13 }
 0x206   : >> { %v883_v8 = vpop.f32.mrf.mxu1  ;;  %v827_v37 = vmul.f32 %v825_v57, %v785_v13  ;;  %v948_v35 = vrot.slane %v947_v55, 2  ;;  %v943_v19 = vadd.f32 %v942_v47, %v941_v0 }
 0x207   : >> { %v890_v40 = vand.u32 2147483647, %v888_v5  ;;  %v889_v16 = vsub.f32 %v887_v10, %v1620_v4  ;;  %v822_v50 = vmul.f32 %v820_v52, %v786_v59  ;;  %v828_v54 = vmul.f32 %v826_v38, %v786_v59 }
 0x208   : >> { %v884_v43 = vpop.f32.mrf.mxu1  ;;  %v823_v49 = vadd.f32 %v821_v45, %v714_v3  ;;  %v829_v60 = vadd.f32 %v827_v37, %v720_v7  ;;  %v949_v4 = vadd.f32 %v948_v35, %v947_v55  ;;  %v944_v6 = vrot.slane %v943_v19, 1 }
 0x209   : >> { %v892_v20 = vmul.f32 5.0, %v890_v40  ;;  %v891_v61 = vand.u32 2147483647, %v889_v16  ;;  %v824_v1 = vadd.f32 %v822_v50, %v715_v26  ;;  %v830_v2 = vadd.f32 %v828_v54, %v721_v28 }
 0x20a   : >> { %v950_v31 = vrot.slane %v949_v4, 1  ;;  %v945_v33 = vadd.f32 %v944_v6, %v943_v19 }
 0x20b   : >> { %v894_v58 = vadd.f32 1.0, %v892_v20  ;;  %v893_v14 = vmul.f32 5.0, %v891_v61 }
 0x20c   : >> { %v951_v57 = vadd.f32 %v950_v31, %v949_v4 }
 0x20d   : >> { %v930_v24 = vmul.f32 %v928_v11, %v894_v58  ;;  %v936_v62 = vmul.f32 %v934_v56, %v894_v58  ;;  %v895_v63 = vadd.f32 1.0, %v893_v14 }
 0x20f   : >> { %v932_v46 = vadd.f32 %v930_v24, %v823_v49  ;;  %v938_v12 = vadd.f32 %v936_v62, %v829_v60  ;;  %v931_v41 = vmul.f32 %v929_v27, %v895_v63  ;;  %v937_v21 = vmul.f32 %v935_v53, %v895_v63 }
 0x211   : >> { %v952_v22 = vrot.slane %v932_v46, 4  ;;  %v964_v15 = vrot.slane %v938_v12, 4  ;;  %v933_v17 = vadd.f32 %v931_v41, %v824_v1  ;;  %v939_v23 = vadd.f32 %v937_v21, %v830_v2 }
 0x213   : >> { %v953_v3 = vadd.f32 %v952_v22, %v932_v46  ;;  %v965_v18 = vadd.f32 %v964_v15, %v938_v12  ;;  %v958_v7 = vrot.slane %v933_v17, 4  ;;  %v970_v48 = vrot.slane %v939_v23, 4 }
 0x215   : >> { %v954_v26 = vrot.slane %v953_v3, 2  ;;  %v966_v28 = vrot.slane %v965_v18, 2  ;;  %v959_v29 = vadd.f32 %v958_v7, %v933_v17  ;;  %v971_v30 = vadd.f32 %v970_v48, %v939_v23 }
 0x217   : >> { %v955_v36 = vadd.f32 %v954_v26, %v953_v3  ;;  %v967_v42 = vadd.f32 %v966_v28, %v965_v18  ;;  %v960_v44 = vrot.slane %v959_v29, 2  ;;  %v972_v32 = vrot.slane %v971_v30, 2 }
 0x219   : >> { %v956_v13 = vrot.slane %v955_v36, 1  ;;  %v968_v5 = vrot.slane %v967_v42, 1  ;;  %v961_v51 = vadd.f32 %v960_v44, %v959_v29  ;;  %v973_v25 = vadd.f32 %v972_v32, %v971_v30 }
 0x21b   : >> { %v957_v34 = vadd.f32 %v956_v13, %v955_v36  ;;  %v969_v10 = vadd.f32 %v968_v5, %v967_v42  ;;  %v962_v8 = vrot.slane %v961_v51, 1  ;;  %v974_v59 = vrot.slane %v973_v25, 1 }
 0x21d   : >> { %v977_v52 = vsel %vm976_vm9, %v945_v33, %v957_v34  ;;  %v963_v38 = vadd.f32 %v962_v8, %v961_v51  ;;  %v975_v39 = vadd.f32 %v974_v59, %v973_v25 }
 0x21e   : >> { %v980_v40 = vsel %vm979_vm10, %v977_v52, %v969_v10  ;;  %223 = sbr.rel (!%p221_p4) target bundleno = 16 (0x10), region = 82 }
 0x21f   : >> { %v983_v16 = vsel %vm982_vm11, %v980_v40, 0.0  ;;  %v978_v43 = vsel %vm976_vm9, %v951_v57, %v963_v38 }
 0x220   : >> { %991 = vst [vmem:[%s990_s16] sm:$0xff] %v983_v16  ;;  %v981_v45 = vsel %vm979_vm10, %v978_v43, %v975_v39 }
 0x221   : >> { %v984_v11 = vsel %vm982_vm11, %v981_v45, 0.0 }
 0x222   : >> { %992 = vst [vmem:[%s990_s16 + $0x8] sm:$0xff] %v984_v11 }
 0x223 PF: > { %s14_s15 = sadd.s32 1, %s1280_s15  }
 0x224   : > { %p11_p5 = scmp.ge.s32.totalorder %s14_s15, 4  }
 0x226   :  { %13 = sbr.rel (!%p11_p5) target bundleno = 1 (0x1), region = 93 }

</bundles_post_ra>
